<compile_context>
chip_gen: v7x
topology: tpu7x:2x2x1
jax: 0.10.0
libtpu: 0.0.40
codegen_flags: <defaults>
</compile_context>

<pallas_src>
import functools

import jax
import jax.numpy as jnp
from jax.experimental import pallas as pl
from jax.experimental.pallas import tpu as pltpu

BIG_NEG = 100000000.0


def actionnet_kernel(patches_ref, wconv_ref, w12_ref, consts_ref, out_ref, *,
                     batch, n_feat, n_hidden, n_extra, n_out):
    B = batch

    # (1) conv3x3 for all four 2x2-pool quadrants as ONE bf16 MXU matmul.
    #     Rows of `patches`/`conv` are (quadrant, batch); columns are the
    #     lane-dense pooled-feature layout col = spatial_pos*16 + out_channel.
    conv = jnp.dot(patches_ref[...], wconv_ref[...],
                   preferred_element_type=jnp.float32)              # (4B, n_feat)

    # (2) 2x2 max-pool == elementwise max over the four quadrant row-blocks,
    #     then conv bias + ReLU (bias add and ReLU commute with the max).
    feat = jnp.maximum(jnp.maximum(conv[0 * B:1 * B], conv[1 * B:2 * B]),
                       jnp.maximum(conv[2 * B:3 * B], conv[3 * B:4 * B]))
    feat = jnp.maximum(feat + consts_ref[0:1, :n_feat], 0.0)        # (B, n_feat)
    feat = feat.astype(jnp.bfloat16)

    # (3) fc1: pooled-feature matmul + extra-option matmul + bias, ReLU.
    opt = consts_ref[2 + B:2 + 2 * B, :n_extra].astype(jnp.bfloat16)
    hidden = (jnp.dot(feat, w12_ref[:n_feat, :],
                      preferred_element_type=jnp.float32)
              + jnp.dot(opt, w12_ref[n_feat:n_feat + n_extra, :],
                        preferred_element_type=jnp.float32)
              + consts_ref[1:2, :n_hidden])
    hidden = jnp.maximum(hidden, 0.0).astype(jnp.bfloat16)          # (B, n_hidden)

    # (4) fc2; fc2 bias + mask penalty were pre-folded into consts rows.
    out = jnp.dot(hidden, w12_ref[n_feat + n_extra:, :n_out],
                  preferred_element_type=jnp.float32)
    out_ref[...] = out + consts_ref[2:2 + B, :n_out]


def action_net_forward(x, option, mask, params):
    """x: (B, H, W, Cin) f32 NHWC; option: (B, E); mask: (B, O)."""
    B, H, W, Cin = x.shape
    OH, OW = H - 2, W - 2                        # valid 3x3 conv
    PH, PW = OH // 2, OW // 2                    # 2x2 max-pool (floor, as torch)
    CO = params["conv_w"].shape[0]               # 16 conv output channels
    n_feat = CO * PH * PW                        # 16*3*3 for H=W=8

    conv_w = params["conv_w"]                    # (16, Cin, 3, 3) torch OIHW
    conv_b = params["conv_b"]                    # (16,)
    fc1_w = params["fc1_w"]                      # (64, n_feat + E)
    fc1_b = params["fc1_b"]                      # (64,)
    fc2_w = params["fc2_w"]                      # (O, 64)
    fc2_b = params["fc2_b"]                      # (O,)
    n_hidden = fc1_b.shape[0]
    O = fc2_w.shape[0]
    opt2 = option.reshape(B, -1).astype(jnp.float32)
    E = opt2.shape[1]
    assert O <= n_hidden, "fc2 output dim packed into the fc1-width weight slab"

    # ---- glue: four pool-quadrant views of the input, quadrant-major rows ----
    Hc, Wc = 2 * PH + 1, 2 * PW + 1
    quads = [x[:, dh:dh + Hc, dw:dw + Wc, :].reshape(B, Hc * Wc * Cin)
             for dh in (0, 1) for dw in (0, 1)]
    patches = jnp.concatenate(quads, axis=0).astype(jnp.bfloat16)   # (4B, Hc*Wc*Cin)

    # ---- glue: block-Toeplitz conv weight, columns = (ph*PW+pw)*CO + co ----
    w_flat = jnp.transpose(conv_w, (2, 3, 1, 0))                    # (3, 3, Cin, CO)
    wconv4 = jnp.zeros((Hc, Wc, Cin, n_feat), jnp.float32)
    for ph in range(PH):
        for pw in range(PW):
            c0 = (ph * PW + pw) * CO
            wconv4 = wconv4.at[2 * ph:2 * ph + 3, 2 * pw:2 * pw + 3,
                               :, c0:c0 + CO].set(w_flat)
    wconv = wconv4.reshape(Hc * Wc * Cin, n_feat).astype(jnp.bfloat16)

    # ---- glue: fc1 (feature rows permuted to our lane order) + fc2, one slab ----
    w1t = fc1_w.T                                                    # (n_feat+E, 64)
    w1f = (w1t[:n_feat].reshape(CO, PH * PW, n_hidden)
           .transpose(1, 0, 2).reshape(n_feat, n_hidden))            # row = s*CO + c
    w2pad = jnp.zeros((n_hidden, n_hidden), jnp.float32).at[:, :O].set(fc2_w.T)
    w12 = jnp.concatenate([w1f, w1t[n_feat:], w2pad], axis=0).astype(jnp.bfloat16)

    # ---- glue: packed f32 constants (biases, mask penalty, option) ----
    width = max(n_feat, n_hidden, O, E)
    consts = jnp.zeros((2 + 2 * B, width), jnp.float32)
    consts = consts.at[0, :n_feat].set(jnp.tile(conv_b, PH * PW))
    consts = consts.at[1, :n_hidden].set(fc1_b)
    consts = consts.at[2:2 + B, :O].set(
        fc2_b[None, :] + (mask.astype(jnp.float32) - 1.0) * BIG_NEG)
    consts = consts.at[2 + B:2 + 2 * B, :E].set(opt2)

    kernel = functools.partial(actionnet_kernel, batch=B, n_feat=n_feat,
                               n_hidden=n_hidden, n_extra=E, n_out=O)
    vmem = pl.BlockSpec(memory_space=pltpu.MemorySpace.VMEM)
    # NOTE: for large B (>=128), tile the 4B quadrant rows / B output rows over
    # a grid axis with dimension_semantics=("parallel",) to use both v7x TCs.
    return pl.pallas_call(
        kernel,
        out_shape=jax.ShapeDtypeStruct((B, O), jnp.float32),
        in_specs=[vmem] * 4,
        out_specs=vmem,
    )(patches, wconv, w12, consts)


def init_params(key, in_ch, out_dim, extra_dim):
    ks = jax.random.split(key, 6)

    def u(k, shape, fan_in):
        bound = 1.0 / jnp.sqrt(jnp.float32(fan_in))
        return jax.random.uniform(k, shape, jnp.float32, -bound, bound)

    n_feat = 16 * 3 * 3
    return dict(
        conv_w=u(ks[0], (16, in_ch, 3, 3), in_ch * 9),
        conv_b=u(ks[1], (16,), in_ch * 9),
        fc1_w=u(ks[2], (64, n_feat + extra_dim), n_feat + extra_dim),
        fc1_b=u(ks[3], (64,), n_feat + extra_dim),
        fc2_w=u(ks[4], (out_dim, 64), 64),
        fc2_b=u(ks[5], (out_dim,), 64),
    )


def reference_forward(x, option, mask, params):
    """Pure-JAX reference mirroring the PyTorch module (NHWC input), f32."""
    B = x.shape[0]
    with jax.default_matmul_precision("highest"):
        x_nchw = jnp.transpose(x, (0, 3, 1, 2))
        y = jax.lax.conv_general_dilated(
            x_nchw, params["conv_w"], window_strides=(1, 1), padding="VALID",
            dimension_numbers=("NCHW", "OIHW", "NCHW"))
        y = jax.nn.relu(y + params["conv_b"][None, :, None, None])
        y = jax.lax.reduce_window(y, -jnp.inf, jax.lax.max,
                                  (1, 1, 2, 2), (1, 1, 2, 2), "VALID")
        y = y.reshape(B, -1)
        y = jnp.concatenate([y, option.reshape(B, -1)], axis=1)
        y = jax.nn.relu(y @ params["fc1_w"].T + params["fc1_b"])
        y = y @ params["fc2_w"].T + params["fc2_b"]
    return y - (1.0 - mask) * BIG_NEG


if __name__ == "__main__":
    key = jax.random.PRNGKey(0)
    B, H, W, Cin = 2, 8, 8, 4          # H=W=8 -> conv 6x6 -> pool 3x3 (=16*3*3 feats)
    out_dim, extra_dim = 6, 4

    kp, kx, ko, km = jax.random.split(key, 4)
    params = init_params(kp, Cin, out_dim, extra_dim)
    x = jax.random.normal(kx, (B, H, W, Cin), jnp.float32)
    option = jax.random.normal(ko, (B, extra_dim), jnp.float32)
    mask = (jax.random.uniform(km, (B, out_dim)) > 0.3).astype(jnp.float32)

    fwd = jax.jit(action_net_forward)
    out = fwd(x, option, mask, params)
    jax.block_until_ready(out)
    assert out.shape == (B, out_dim)

    ref = reference_forward(x, option, mask, params)
    # bf16 MXU operands with f32 accumulation -> compare at bf16-level tolerance.
    assert jnp.allclose(out, ref, rtol=2e-2, atol=2e-2), "mismatch vs reference"

    print("KERNEL_OK")
</pallas_src>

<mosaic_0001>
module attributes {stable_mosaic.version = 11 : i64} {
  func.func @actionnet_kernel(%arg0: memref<8x196xbf16, #tpu.memory_space<vmem>>, %arg1: memref<196x144xbf16, #tpu.memory_space<vmem>>, %arg2: memref<212x64xbf16, #tpu.memory_space<vmem>>, %arg3: memref<6x144xf32, #tpu.memory_space<vmem>>, %arg4: memref<2x6xf32, #tpu.memory_space<vmem>>) attributes {dimension_semantics = [], scalar_prefetch = 0 : i64, scratch_operands = 0 : i64, tpu.core_type = #tpu.core_type<tc>} {
    %c0 = arith.constant 0 : index
    %c0_0 = arith.constant 0 : index
    %0 = vector.load %arg0[%c0, %c0_0] : memref<8x196xbf16, #tpu.memory_space<vmem>>, vector<8x196xbf16>
    %c0_1 = arith.constant 0 : index
    %c0_2 = arith.constant 0 : index
    %1 = vector.load %arg1[%c0_1, %c0_2] : memref<196x144xbf16, #tpu.memory_space<vmem>>, vector<196x144xbf16>
    %cst = arith.constant dense<0.000000e+00> : vector<8x144xf32>
    %2 = tpu.matmul %0, %1, %cst {dimension_numbers = #tpu.dot_dimension_numbers<[1], [0], [0], [1], [0, 0, 1, 1], [], []>} : vector<8x196xbf16>, vector<196x144xbf16>, vector<8x144xf32> -> vector<8x144xf32>
    %3 = vector.extract_strided_slice %2 {offsets = [0, 0], sizes = [2, 144], strides = [1, 1]} : vector<8x144xf32> to vector<2x144xf32>
    %4 = vector.extract_strided_slice %2 {offsets = [2, 0], sizes = [2, 144], strides = [1, 1]} : vector<8x144xf32> to vector<2x144xf32>
    %5 = arith.maximumf %3, %4 : vector<2x144xf32>
    %6 = vector.extract_strided_slice %2 {offsets = [4, 0], sizes = [2, 144], strides = [1, 1]} : vector<8x144xf32> to vector<2x144xf32>
    %7 = vector.extract_strided_slice %2 {offsets = [6, 0], sizes = [2, 144], strides = [1, 1]} : vector<8x144xf32> to vector<2x144xf32>
    %8 = arith.maximumf %6, %7 : vector<2x144xf32>
    %9 = arith.maximumf %5, %8 : vector<2x144xf32>
    %c0_3 = arith.constant 0 : index
    %c0_4 = arith.constant 0 : index
    %10 = vector.load %arg3[%c0_3, %c0_4] : memref<6x144xf32, #tpu.memory_space<vmem>>, vector<1x144xf32>
    %11 = vector.broadcast %10 : vector<1x144xf32> to vector<2x144xf32>
    %12 = arith.addf %9, %11 : vector<2x144xf32>
    %cst_5 = arith.constant 0.000000e+00 : f32
    %13 = vector.broadcast %cst_5 : f32 to vector<2x144xf32>
    %14 = arith.maximumf %12, %13 : vector<2x144xf32>
    %15 = arith.truncf %14 : vector<2x144xf32> to vector<2x144xbf16>
    %c4 = arith.constant 4 : index
    %c0_6 = arith.constant 0 : index
    %16 = vector.load %arg3[%c4, %c0_6] : memref<6x144xf32, #tpu.memory_space<vmem>>, vector<2x4xf32>
    %17 = arith.truncf %16 : vector<2x4xf32> to vector<2x4xbf16>
    %c0_7 = arith.constant 0 : index
    %c0_8 = arith.constant 0 : index
    %18 = vector.load %arg2[%c0_7, %c0_8] : memref<212x64xbf16, #tpu.memory_space<vmem>>, vector<144x64xbf16>
    %cst_9 = arith.constant dense<0.000000e+00> : vector<2x64xf32>
    %19 = tpu.matmul %15, %18, %cst_9 {dimension_numbers = #tpu.dot_dimension_numbers<[1], [0], [0], [1], [0, 0, 1, 1], [], []>} : vector<2x144xbf16>, vector<144x64xbf16>, vector<2x64xf32> -> vector<2x64xf32>
    %c144 = arith.constant 144 : index
    %c0_10 = arith.constant 0 : index
    %20 = vector.load %arg2[%c144, %c0_10] : memref<212x64xbf16, #tpu.memory_space<vmem>>, vector<4x64xbf16>
    %cst_11 = arith.constant dense<0.000000e+00> : vector<2x64xf32>
    %21 = tpu.matmul %17, %20, %cst_11 {dimension_numbers = #tpu.dot_dimension_numbers<[1], [0], [0], [1], [0, 0, 1, 1], [], []>} : vector<2x4xbf16>, vector<4x64xbf16>, vector<2x64xf32> -> vector<2x64xf32>
    %22 = arith.addf %19, %21 : vector<2x64xf32>
    %c1 = arith.constant 1 : index
    %c0_12 = arith.constant 0 : index
    %23 = vector.load %arg3[%c1, %c0_12] : memref<6x144xf32, #tpu.memory_space<vmem>>, vector<1x64xf32>
    %24 = vector.broadcast %23 : vector<1x64xf32> to vector<2x64xf32>
    %25 = arith.addf %22, %24 : vector<2x64xf32>
    %cst_13 = arith.constant 0.000000e+00 : f32
    %26 = vector.broadcast %cst_13 : f32 to vector<2x64xf32>
    %27 = arith.maximumf %25, %26 : vector<2x64xf32>
    %28 = arith.truncf %27 : vector<2x64xf32> to vector<2x64xbf16>
    %c148 = arith.constant 148 : index
    %c0_14 = arith.constant 0 : index
    %29 = vector.load %arg2[%c148, %c0_14] : memref<212x64xbf16, #tpu.memory_space<vmem>>, vector<64x6xbf16>
    %cst_15 = arith.constant dense<0.000000e+00> : vector<2x6xf32>
    %30 = tpu.matmul %28, %29, %cst_15 {dimension_numbers = #tpu.dot_dimension_numbers<[1], [0], [0], [1], [0, 0, 1, 1], [], []>} : vector<2x64xbf16>, vector<64x6xbf16>, vector<2x6xf32> -> vector<2x6xf32>
    %c2 = arith.constant 2 : index
    %c0_16 = arith.constant 0 : index
    %31 = vector.load %arg3[%c2, %c0_16] : memref<6x144xf32, #tpu.memory_space<vmem>>, vector<2x6xf32>
    %32 = arith.addf %30, %31 : vector<2x6xf32>
    %c0_17 = arith.constant 0 : index
    %c0_18 = arith.constant 0 : index
    %33 = vector.load %arg4[%c0_17, %c0_18] : memref<2x6xf32, #tpu.memory_space<vmem>>, vector<2x6xf32>
    tpu.vector_store %arg4[%c0_17, %c0_18], %32 {strides = array<i32>} : memref<2x6xf32, #tpu.memory_space<vmem>>, vector<2x6xf32>,
    return
  }
}

</mosaic_0001>

<bundles_post_ra>
// kernel: tile.8
= control target key start
LH: loop header
LB: loop body
LE: loop exit
PB: predicated region body
PF: predicated region fallthrough
CT: control target
= control target key end

     0   :  { %s28_s0 = inlined_call_operand.vmem [shape: f32[16], index: 0, kind: input, shape index: {}]   ;;  %s29_s1 = inlined_call_operand.vmem [shape: f32[9,16], index: 1, kind: output, shape index: {}]  }
   0x1   :  { %v4_v0 = vld [vmem:[%s28_s0] ss:$0 sm:$0xff] }
   0x2   :  { %5 = vst [vmem:[%s29_s1] sm:$0xff] %v4_v0  ;;  %8 = vst [vmem:[%s29_s1 + $0x8] sm:$0xff] %v4_v0 }

// kernel: action_net_forward.1
= control target key start
LH: loop header
LB: loop body
LE: loop exit
PB: predicated region body
PF: predicated region fallthrough
CT: control target
= control target key end

     0   :  { %v698_v3 = vmov 0.0   ;;  %vm699_vm0 = vmmov 0   ;;  %vm180_vm1 = vcmask 1041408   ;;  %vm176_vm2 = vcmask 556032   ;;  %s897_s0 = inlined_call_operand.vmem [shape: bf16[8,196], index: 0, kind: input, shape index: {}]   ;;  %s898_s1 = inlined_call_operand.vmem [shape: bf16[196,144], index: 1, kind: input, shape index: {}]   ;;  %s899_s2 = inlined_call_operand.vmem [shape: bf16[212,64], index: 2, kind: input, shape index: {}]   ;;  %s900_s3 = inlined_call_operand.vmem [shape: f32[6,144], index: 3, kind: input, shape index: {}]   ;;  %s901_s4 = inlined_call_operand.hbm [shape: f32[2,6], index: 4, kind: output, shape index: {}]  }
   0x1   :  { %v620_v0 = vld [vmem:[%s898_s1 + $0x4] ss:$8 sps:$4 sm:$0xff]   ;;  %v622_v1 = vld [vmem:[%s898_s1] ss:$8 sps:$4 sm:$0xff]   ;;  %v623_v2 = vld [vmem:[%s898_s1 + $0x14] ss:$8 sps:$4 sm:$0xff]   ;;  %598 = vmatprep.subr.bf16.mxu1 %v698_v3  ;;  %600 = vmatprep.mubr.msk.bf16.mxu1 %vm699_vm0, %v698_v3 }
   0x2   :  { %187 = vmatprep.subr.bf16.mxu0 %v620_v0  ;;  %v625_v4 = vld [vmem:[%s898_s1 + $0x10] ss:$8 sps:$4 sm:$0xff]   ;;  %v626_v5 = vld [vmem:[%s898_s1 + $0x24] ss:$8 sps:$4 sm:$0xff]   ;;  %v628_v6 = vld [vmem:[%s898_s1 + $0x20] ss:$8 sps:$4 sm:$0xff]  }
   0x3   :  { %188 = vmatpush1.bf16.msra.mxu0 %v622_v1  ;;  %v629_v7 = vld [vmem:[%s898_s1 + $0x34] ss:$8 sps:$4 sm:$0xff]   ;;  %v631_v8 = vld [vmem:[%s898_s1 + $0x30] ss:$8 sps:$4 sm:$0xff]   ;;  %v632_v9 = vld [vmem:[%s898_s1 + $0x44] ss:$8 sps:$4 sm:$0xff]  }
   0x4   :  { %189 = vmatprep.subr.bf16.mxu0 %v623_v2  ;;  %v634_v10 = vld [vmem:[%s898_s1 + $0x40] ss:$8 sps:$4 sm:$0xff]   ;;  %v635_v11 = vld [vmem:[%s898_s1 + $0x54] ss:$8 sps:$4 sm:$0xff]   ;;  %vm285_vm3 = vcmask 31744   ;;  %v700_v23 = vmov 0  }
   0x5   :  { %v766_v12 = vld [vmem:[%s897_s0] sm:$0xff]  ;;  %v282_v13 = vld [vmem:[%s899_s2 + $0x48] sm:$0x3]  ;;  %v637_v14 = vld [vmem:[%s898_s1 + $0x50] ss:$8 sps:$4 sm:$0xff]  }
   0x6   :  { %v545_v15 = vcombine.high %v766_v12, %v766_v12  ;;  %v262_v16 = vld [vmem:[%s900_s3] sm:$0x30]  ;;  %v290_v17 = vsel %vm180_vm1, %v282_v13, 0  ;;  %v640_v22 = vld [vmem:[%s898_s1 + $0x60] ss:$8 sps:$4 sm:$0xff]   ;;  %v662_v28 = vld [vmem:[%s899_s2 + $0x10] sm:$0xff]  }
   0x7   :  { %190 = vmatpush1.bf16.msra.mxu0 %v625_v4  ;;  %v263_v18 = vpack.c.bf16 %v262_v16, %v262_v16  ;;  %v638_v19 = vld [vmem:[%s898_s1 + $0x64] ss:$8 sps:$4 sm:$0xff]   ;;  %599 = vmatpush3.bf16.msra.mxu1 %v290_v17  ;;  %v641_v24 = vld [vmem:[%s898_s1 + $0x74] ss:$8 sps:$4 sm:$0xff]   ;;  %v643_v26 = vld [vmem:[%s898_s1 + $0x70] ss:$8 sps:$4 sm:$0xff]  }
   0x8   :  { %191 = vmatprep.subr.bf16.mxu0 %v626_v5  ;;  %573 = vmatprep.mubr.msk.bf16.mxu0 %vm176_vm2, %v545_v15  ;;  %v660_v21 = vld [vmem:[%s899_s2] sm:$0xff]   ;;  %v661_v25 = vld [vmem:[%s899_s2 + $0x8] sm:$0xff]  }
   0x9   :  { %v284_v20 = vrot.slane %v263_v18, 2  ;;  %390 = vmatprep.subr.bf16.mxu1 %v700_v23  ;;  %v644_v27 = vld [vmem:[%s898_s1 + $0x84] ss:$8 sps:$4 sm:$0xff]  }
   0xb   :  { %192 = vmatpush1.bf16.msra.mxu0 %v628_v6  ;;  %601 = vmatmul.mubr.msk.bf16.vlgmr.msra.gmra.mrb[0].mxu1 %vm285_vm3, %v284_v20 }
   0xc   :  { %193 = vmatprep.subr.bf16.mxu0 %v629_v7  ;;  %391 = vmatpush1.bf16.msra.mxu1 %v660_v21 }
   0xd   :  { %392 = vmatprep.subr.bf16.mxu1 %v700_v23 }
   0xf   :  { %194 = vmatpush1.bf16.msra.mxu0 %v631_v8 }
  0x10   :  { %195 = vmatprep.subr.bf16.mxu0 %v632_v9  ;;  %393 = vmatpush1.bf16.msra.mxu1 %v661_v25 }
  0x13   :  { %196 = vmatpush1.bf16.msra.mxu0 %v634_v10 }
  0x14   :  { %197 = vmatprep.subr.bf16.mxu0 %v635_v11 }
  0x17   :  { %198 = vmatpush1.bf16.msra.mxu0 %v637_v14 }
  0x18   :  { %199 = vmatprep.subr.bf16.mxu0 %v638_v19 }
  0x1b   :  { %200 = vmatpush1.bf16.msra.mxu0 %v640_v22 }
  0x1c   :  { %201 = vmatprep.subr.bf16.mxu0 %v641_v24 }
  0x1d   :  { %9 = vsyncpa [#allocation3], 0  ;;  %394 = vmatprep.subr.bf16.mxu1 %v700_v23  ;;  %v646_v29 = vld [vmem:[%s898_s1 + $0x80] ss:$8 sps:$4 sm:$0xff]   ;;  %v647_v30 = vld [vmem:[%s898_s1 + $0x94] ss:$8 sps:$4 sm:$0xff]   ;;  %v544_v42 = vcombine.low %v766_v12, %v766_v12  ;;  %v246_v51 = vlaneseq }
  0x1e   :  { %395 = vmatpush1.bf16.msra.mxu1 %v662_v28  ;;  %v663_v31 = vld [vmem:[%s899_s2 + $0x18] sm:$0xff]   ;;  %v650_v33 = vld [vmem:[%s898_s1 + $0xa4] ss:$8 sps:$4 sm:$0xff]   ;;  %v652_v35 = vld [vmem:[%s898_s1 + $0xa0] ss:$8 sps:$4 sm:$0xff]   ;;  %vm467_vm4 = vcmask 1045504  }
  0x1f   :  { %202 = vmatpush1.bf16.msra.mxu0 %v643_v26  ;;  %396 = vmatprep.subr.bf16.mxu1 %v700_v23  ;;  %v649_v32 = vld [vmem:[%s898_s1 + $0x90] ss:$8 sps:$4 sm:$0xff]   ;;  %v664_v34 = vld [vmem:[%s899_s2 + $0x20] sm:$0xff]   ;;  %v653_v36 = vld [vmem:[%s898_s1 + $0xb4] ss:$8 sps:$4 sm:$0xff]   ;;  %v247_v52 = vshrl.u32 %v246_v51, 7 }
  0x20   :  { %203 = vmatprep.subr.bf16.mxu0 %v644_v27  ;;  %v44_v37 = vld [vmem:[%s898_s1 + $0xc0] sm:$0x33]  ;;  %v655_v38 = vld [vmem:[%s898_s1 + $0xb0] ss:$8 sps:$4 sm:$0xff]   ;;  %v665_v43 = vld [vmem:[%s899_s2 + $0x28] sm:$0xff]   ;;  %vm386_vm5 = vcmask 130048  }
  0x21   :  { %v571_v39 = vcombine.high %v44_v37, %v44_v37  ;;  %v570_v40 = vcombine.low %v44_v37, %v44_v37  ;;  %v666_v44 = vld [vmem:[%s899_s2 + $0x30] sm:$0xff]   ;;  %v667_v45 = vld [vmem:[%s899_s2 + $0x38] sm:$0xff]   ;;  %v668_v46 = vld [vmem:[%s899_s2 + $0x40] sm:$0xff]   ;;  %v248_v55 = vsub.s32 0, %v247_v52  ;;  %v252_v59 = vsub.s32 1, %v247_v52  ;;  %s701_s22 = smov [#allocation2]  }
  0x22   :  { %397 = vmatpush1.bf16.msra.mxu1 %v663_v31  ;;  %v244_v57 = vld [vmem:[%s900_s3] ss:$8 sm:$0x3]  ;;  %v669_v6 = vld [vmem:[%s899_s2 + $0x48] sm:$0xfc]   ;;  %v670_v7 = vld [vmem:[%s899_s2 + $0x50] sm:$0xff]  }
  0x23   :  { %204 = vmatpush1.bf16.msra.mxu0 %v646_v29  ;;  %398 = vmatprep.subr.bf16.mxu1 %v700_v23  ;;  %v182_v41 = vsel %vm180_vm1, %v570_v40, 0  ;;  %v249_v1 = vrot.slane %v244_v57, %v248_v55  ;;  %v253_v4 = vrot.slane %v244_v57, %v252_v59  ;;  %v468_v12 = vrot.slane %v669_v6, 2  ;;  %v671_v14 = vld [vmem:[%s899_s2 + $0x58] sm:$0xff]   ;;  %v672_v21 = vld [vmem:[%s899_s2 + $0x60] sm:$0xff]   ;;  %s536_s23 = sshll.u32 %s701_s22, 4  ;;  %s537_s23 = int_to_ptr.vmem [resolvable:$true] %s536_s23 }
  0x24   :  { %205 = vmatprep.subr.bf16.mxu0 %v647_v30  ;;  %v469_v13 = vrot.slane %v670_v7, 2  ;;  %v471_v19 = vrot.slane %v671_v14, 2  ;;  %v473_v22 = vrot.slane %v672_v21, 2  ;;  %v673_v24 = vld [vmem:[%s899_s2 + $0x68] ss:$0 sps:$4 sm:$0x33]   ;;  %p679_p1 = scmp.lt.s32.totalorder %s537_s23, %s537_s23 }
  0x25   :  { %v475_v25 = vrot.slane %v673_v24, 2  ;;  %v430_v28 = vld [vmem:[%s900_s3 + $0x1] ss:$0 sm:$0xff]  ;;  %vm484_vm6 = vcmask 523264   ;;  %vm528_vm7 = vcmask 41984   ;;  %s674_s24 = scalar_lea.vmem %s537_s23, 32 }
  0x26   :  { %399 = vmatpush1.bf16.msra.mxu1 %v664_v34  ;;  %v470_v18 = vsel %vm467_vm4, %v468_v12, %v469_v13  ;;  %v472_v20 = vsel %vm467_vm4, %v469_v13, %v471_v19  ;;  %p675_p0 = scmp.ne.s32.totalorder %s537_s23, %s674_s24  ;;  %p680_p2 = scmp.lt.s32.totalorder %s674_s24, %s674_s24 }
  0x27   :  { %206 = vmatpush1.bf16.msra.mxu0 %v649_v32  ;;  %400 = vmatprep.subr.bf16.mxu1 %v700_v23  ;;  %v476_v26 = vsel %vm467_vm4, %v473_v22, %v475_v25 }
  0x28   :  { %207 = vmatprep.subr.bf16.mxu0 %v650_v33  ;;  %p681_p3 = por %p680_p2, %p679_p1 }
  0x2a   :  { %401 = vmatpush1.bf16.msra.mxu1 %v665_v43  ;;  %p682_p4 = pnand %p681_p3, %p675_p0 }
  0x2b   :  { %208 = vmatpush1.bf16.msra.mxu0 %v652_v35  ;;  %402 = vmatprep.subr.bf16.mxu1 %v700_v23 }
  0x2c   :  { %209 = vmatprep.subr.bf16.mxu0 %v653_v36 }
  0x2e   :  { %403 = vmatpush1.bf16.msra.mxu1 %v666_v44 }
  0x2f   :  { %210 = vmatpush1.bf16.msra.mxu0 %v655_v38  ;;  %404 = vmatprep.subr.bf16.mxu1 %v700_v23 }
  0x30   :  { %572 = vmatprep.subr.msk.bf16.mxu0 %vm180_vm1, %v571_v39 }
  0x32   :  { %405 = vmatpush1.bf16.msra.mxu1 %v667_v45 }
  0x33   :  { %212 = vmatpush1.bf16.msra.mxu0 %v182_v41  ;;  %406 = vmatprep.subr.bf16.mxu1 %v700_v23  ;;  %v474_v23 = vsel %vm467_vm4, %v471_v19, %v473_v22 }
  0x36   :  { %220 = vmatmul.mubr.bf16.vlgmr.msra.gmra.mrb[0].mxu0 %v544_v42  ;;  %407 = vmatpush1.bf16.msra.mxu1 %v668_v46 }
  0x37   :  { %604 = vmatprep.subr.bf16.mxu1 %v698_v3 }
  0xde   :  { %v326_v47 = vpop.f32.mrb[0].mxu1 }
  0xdf   :  { %v602_v48 = vpop.f32.mrb[1].mxu1 }
  0xe0   :  { %v329_v49 = vpop.f32.mrb[2].mxu1 }
  0xe1   :  { %v603_v50 = vpop.f32.mrb[3].mxu1 }
 0x109   :  { %v221_v53 = vpop.f32.mrb[0].mxu0 }
 0x10a   :  { %v230_v54 = vrot.slane %v221_v53, 2  ;;  %v223_v56 = vpop.f32.mrb[1].mxu0 }
 0x10b   :  { %v231_v58 = vrot.slane %v223_v56, 2  ;;  %v225_v60 = vpop.f32.mrb[2].mxu0 }
 0x10c   :  { %v234_v61 = vmax.f32 %v221_v53, %v230_v54  ;;  %v226_v62 = vpop.f32.mrb[3].mxu0 }
 0x10d   :  { %v235_v63 = vmax.f32 %v223_v56, %v231_v58 }
 0x10e   :  { %v238_v0 = vrot.slane %v234_v61, 4 }
 0x10f   :  { %v239_v2 = vrot.slane %v235_v63, 4 }
 0x110   :  { %v242_v5 = vmax.f32 %v234_v61, %v238_v0 }
 0x111   :  { %v243_v8 = vmax.f32 %v235_v63, %v239_v2 }
 0x112   :  { %v256_v9 = vadd.f32 %v249_v1, %v242_v5 }
 0x113   :  { %v257_v10 = vadd.f32 %v253_v4, %v243_v8 }
 0x114   :  { %v258_v11 = vmax.f32 %v256_v9, 0.0 }
 0x115   :  { %v259_v15 = vmax.f32 %v257_v10, 0.0 }
 0x116   :  { %v260_v17 = vpack.c.bf16 %v258_v11, %v258_v11 }
 0x117   :  { %v261_v16 = vpack.c.bf16 %v259_v15, %v259_v15 }
 0x119   :  { %584 = vmatprep.mubr.msk.bf16.mxu1 %vm386_vm5, %v261_v16 }
 0x11a   :  { %423 = vmatmul.mubr.bf16.vlgmr.msra.gmra.mrb[4].mxu1 %v260_v17 }
 0x11b   :  { %605 = vmatpush3.bf16.msra.mxu1 %v470_v18  ;;  %612 = vmatprep.mubr.msk.bf16.mxu1 %vm699_vm0, %v698_v3 }
 0x11c   :  { %606 = vmatprep.subr.bf16.mxu1 %v698_v3 }
 0x11f   :  { %607 = vmatpush3.bf16.msra.mxu1 %v472_v20 }
 0x120   :  { %608 = vmatprep.subr.bf16.mxu1 %v698_v3 }
 0x123   :  { %609 = vmatpush3.bf16.msra.mxu1 %v474_v23 }
 0x124   :  { %610 = vmatprep.subr.bf16.mxu1 %v698_v3  ;;  %v443_v3 = vld [vmem:[%s900_s3] sm:$0xc] }
 0x125   :  { %v482_v36 = vrot.slane %v443_v3, 2 }
 0x127   :  { %611 = vmatpush3.bf16.msra.mxu1 %v476_v26 }
 0x1ed   :  { %v424_v27 = vpop.f32.mrb[4].mxu1 }
 0x1ee   :  { %v425_v29 = vadd.f32 %v424_v27, %v326_v47  ;;  %v426_v30 = vpop.f32.mrb[5].mxu1 }
 0x1ef   :  { %v427_v31 = vpop.f32.mrb[6].mxu1 }
 0x1f0   :  { %v431_v32 = vadd.f32 %v430_v28, %v425_v29  ;;  %v428_v33 = vpop.f32.mrb[7].mxu1 }
 0x1f2   :  { %v432_v34 = vmax.f32 %v431_v32, 0.0 }
 0x1f4   :  { %v433_v35 = vpack.c.bf16 %v432_v34, %v432_v34 }
 0x1f6   :  { %613 = vmatmul.mubr.msk.bf16.vlgmr.msra.gmra.mrb[8].mxu1 %vm484_vm6, %v433_v35 }
 0x2c9   :  { %v522_v37 = vpop.f32.mrb[8].mxu1 }
 0x2ca   :  { %v523_v38 = vadd.f32 %v522_v37, %v482_v36  ;;  %v614_v39 = vpop.f32.mrb[9].mxu1 }
 0x2cb   :  { %v525_v40 = vpop.f32.mrb[10].mxu1 }
 0x2cc   :  { %v615_v41 = vpop.f32.mrb[11].mxu1  ;;  %529 = vst.msk [vmem:[#allocation2] sm:$0x3] %vm528_vm7, %v523_v38 }
 0x2cd   :  { %685 = shalt.err (!%p682_p4)
}
 0x2ce   :  { %s686_s26 = scalar_lea.hbm %s901_s4, 32 }
 0x2cf   :  { %p687_p5 = scmp.ne.s32.totalorder %s901_s4, %s686_s26  ;;  %p690_p6 = scmp.lt.u32.totalorder %s686_s26, %s901_s4 }
 0x2d1   :  { %p692_p7 = pnand %p690_p6, %p687_p5 }
 0x2d3   :  { %695 = shalt.err (!%p692_p7)
}
 0x2d4   :  { %539 = dma.vmem_to_hbm [thread:$0]  %s537_s23, 32, %s901_s4, [#allocation3]  }
 0x2d5   :  { %696 = dma.done.wait [#allocation3], 32  }
 0x2d6   :  { %697 = vsyncadd [#allocation3], 4294967264 }
 0x2d7   :  { %543 = vsyncpa [#allocation3], 1 }

</bundles_post_ra>
